<compile_context>
chip_gen: v5e
topology: v5e:2x2
jax: 0.10.0
libtpu: 0.0.40
codegen_flags: <defaults>
</compile_context>

<pallas_src>
import functools

import jax
import jax.numpy as jnp
from jax.experimental import pallas as pl
from jax.experimental.pallas import tpu as pltpu

_VMEM_LIMIT = 32 * 1024 * 1024          # safe scoped-VMEM limit on v5e/v6e/v7x
_VMEM_INPUT_BUDGET = 16 * 1024 * 1024   # budget for the pipelined input buffers


def _sse_kernel(x_ref, y_ref, out_ref, *, n_rows, row_tile, inner):
    """Accumulate per-lane partial sums of (x - y)^2 over a streamed row-tile."""
    p = pl.program_id(0)
    i = pl.program_id(1)

    # Output block index is constant along the (arbitrary) inner axis, so the
    # block stays VMEM-resident; zero it on the first inner step of each part.
    @pl.when(i == 0)
    def _():
        out_ref[...] = jnp.zeros_like(out_ref)

    dx = x_ref[...].astype(jnp.float32) - y_ref[...].astype(jnp.float32)
    row0 = (p * inner + i) * row_tile
    rows = row0 + jax.lax.broadcasted_iota(jnp.int32, dx.shape, 0)
    # Masks both the ragged last block and any overflow steps of the parts split.
    sq = jnp.where(rows < n_rows, dx * dx, 0.0)
    out_ref[...] += jnp.sum(sq, axis=0, keepdims=True)[None]


def _penalty_kernel(h_ref, out_ref, *, n_rows, row_tile):
    """Accumulate per-batch, per-lane partial sums of (h - 0.5)^2."""
    i = pl.program_id(1)

    @pl.when(i == 0)
    def _():
        out_ref[...] = jnp.zeros_like(out_ref)

    hv = h_ref[0].astype(jnp.float32) - 0.5
    rows = i * row_tile + jax.lax.broadcasted_iota(jnp.int32, hv.shape, 0)
    sq = jnp.where(rows < n_rows, hv * hv, 0.0)
    out_ref[...] += jnp.sum(sq, axis=0, keepdims=True)[None]


def _row_tile(n_rows, minor, itemsize, n_bufs, block_bytes):
    """Pick (rows_per_block, num_blocks) for streaming a (n_rows, minor) array."""
    hbm_row = max(1, minor * itemsize)
    # Conservative VMEM estimate per row: lanes padded to a multiple of 128,
    # 32-bit lane slots (over-estimates sub-32-bit dtypes, which is safe).
    vmem_row = ((minor + 127) // 128) * 128 * 4
    tr = max(1, block_bytes // hbm_row)
    tr = min(tr, max(1, _VMEM_INPUT_BUDGET // (n_bufs * vmem_row)))
    tr = max(8, (tr // 8) * 8)          # sublane multiple for the block spec
    if tr >= n_rows:
        return n_rows, 1                # single full-extent block (any n_rows OK)
    return tr, pl.cdiv(n_rows, tr)


def _num_tensorcores():
    # TODO(synk): replace the device_kind sniff with a real per-chip core-count
    # query; only v7x has 2 TensorCores per chip today.
    try:
        kind = jax.devices()[0].device_kind.lower()
    except Exception:
        return 1
    return 2 if "v7" in kind else 1


def sparse_rmse_loss(
    x, y, h, *, eps=1e-10, penalty_factor=0.005,
    block_bytes=4 << 20, parts=None, min_penalty_pallas_bytes=1 << 20,
):
    assert x.shape == y.shape and x.ndim == 3 and h.ndim == 3
    B, S, D = x.shape
    _, Sh, H = h.shape
    assert h.shape[0] == B

    use_core_parallel = False
    if parts is None:
        cores = _num_tensorcores()
        parts = cores
        use_core_parallel = cores > 1   # CORE_PARALLEL only when it matches HW
    parts = max(1, int(parts))

    # ----------------- Kernel 1: SSE of (x - y) over all elements -----------
    n_true = B * S * D
    R = B * S
    x2 = x.reshape(R, D)                # contiguous reshape: metadata only
    y2 = y.reshape(R, D)
    tr, g_total = _row_tile(R, D, x.dtype.itemsize, n_bufs=4, block_bytes=block_bytes)
    if parts > g_total:                 # not enough blocks to split -> 1 part
        parts = 1
        use_core_parallel = False
    inner = pl.cdiv(g_total, parts)
    last_blk = g_total - 1

    def sse_in_map(p, i):
        # Clamp so the block index is always valid; overflow steps re-read the
        # last block but contribute 0 through the in-kernel row mask.
        return (jnp.minimum(p * inner + i, last_blk), 0)

    def _run_sse(part_sem):
        return pl.pallas_call(
            functools.partial(_sse_kernel, n_rows=R, row_tile=tr, inner=inner),
            out_shape=jax.ShapeDtypeStruct((parts, 1, D), jnp.float32),
            grid_spec=pltpu.PrefetchScalarGridSpec(
                num_scalar_prefetch=0,
                grid=(parts, inner),
                in_specs=[
                    pl.BlockSpec((tr, D), sse_in_map),
                    pl.BlockSpec((tr, D), sse_in_map),
                ],
                out_specs=pl.BlockSpec((1, 1, D), lambda p, i: (p, 0, 0)),
            ),
            compiler_params=pltpu.CompilerParams(
                dimension_semantics=(part_sem, "arbitrary"),
                vmem_limit_bytes=_VMEM_LIMIT,
            ),
        )(x2, y2)

    if use_core_parallel:
        try:
            sse_parts = _run_sse(pltpu.CORE_PARALLEL)   # both v7x TCs stream HBM
        except Exception:
            sse_parts = _run_sse("arbitrary")
    else:
        sse_parts = _run_sse("arbitrary")

    rmse = jnp.sqrt(jnp.sum(sse_parts) / float(n_true) + eps)

    # ----------------- Penalty: ||h - 0.5||_F over dims (1, 2) --------------
    if h.size * h.dtype.itemsize < min_penalty_pallas_bytes:
        # Tiny h: a second kernel launch + stream is pure overhead.
        hd = h.astype(jnp.float32) - 0.5
        pen = jnp.sqrt(jnp.sum(hd * hd, axis=(1, 2)))
    else:
        ts, g2 = _row_tile(Sh, H, h.dtype.itemsize, n_bufs=2, block_bytes=block_bytes)
        pen_parts = pl.pallas_call(
            functools.partial(_penalty_kernel, n_rows=Sh, row_tile=ts),
            out_shape=jax.ShapeDtypeStruct((B, 1, H), jnp.float32),
            grid_spec=pltpu.PrefetchScalarGridSpec(
                num_scalar_prefetch=0,
                grid=(B, g2),
                in_specs=[pl.BlockSpec((1, ts, H), lambda b, i: (b, i, 0))],
                out_specs=pl.BlockSpec((1, 1, H), lambda b, i: (b, 0, 0)),
            ),
            compiler_params=pltpu.CompilerParams(
                dimension_semantics=("parallel", "arbitrary"),
                vmem_limit_bytes=_VMEM_LIMIT,
            ),
        )(h)
        pen = jnp.sqrt(jnp.sum(pen_parts, axis=(1, 2)))

    return rmse + penalty_factor * pen


def _reference(x, y, h, *, eps=1e-10, penalty_factor=0.005):
    mse = jnp.mean((x.astype(jnp.float32) - y.astype(jnp.float32)) ** 2)
    rmse = jnp.sqrt(mse + eps)
    pen = jnp.sqrt(jnp.sum((h.astype(jnp.float32) - 0.5) ** 2, axis=(1, 2)))
    return rmse + penalty_factor * pen


if __name__ == "__main__":
    # Case 1: small, nicely shaped inputs (penalty folds into the jnp epilogue).
    B, S, D, H = 2, 8, 32, 16
    kx, ky, kh = jax.random.split(jax.random.PRNGKey(0), 3)
    x = jax.random.normal(kx, (B, S, D), dtype=jnp.float32)
    y = jax.random.normal(ky, (B, S, D), dtype=jnp.float32)
    h = jax.random.uniform(kh, (B, S, H), dtype=jnp.float32)

    out = jax.block_until_ready(sparse_rmse_loss(x, y, h))
    ref = _reference(x, y, h)
    assert out.shape == (B,)
    assert jnp.allclose(out, ref, atol=1e-5, rtol=1e-5), (out, ref)

    # Case 2: same inputs, force the Pallas penalty kernel.
    out2 = jax.block_until_ready(
        sparse_rmse_loss(x, y, h, min_penalty_pallas_bytes=0))
    assert jnp.allclose(out2, ref, atol=1e-5, rtol=1e-5), (out2, ref)

    # Case 3: odd / ragged shapes with tiny blocks and an explicit 2-way part
    # split — exercises the row masks, multi-step accumulation and parts logic.
    B3, S3, D3, Sh3, H3 = 3, 13, 33, 21, 19
    k1, k2, k3 = jax.random.split(jax.random.PRNGKey(1), 3)
    x3 = jax.random.normal(k1, (B3, S3, D3), dtype=jnp.float32)
    y3 = jax.random.normal(k2, (B3, S3, D3), dtype=jnp.float32)
    h3 = jax.random.uniform(k3, (B3, Sh3, H3), dtype=jnp.float32)

    out3 = jax.block_until_ready(
        sparse_rmse_loss(x3, y3, h3, block_bytes=512, parts=2,
                         min_penalty_pallas_bytes=0))
    ref3 = _reference(x3, y3, h3)
    assert out3.shape == (B3,)
    assert jnp.allclose(out3, ref3, atol=1e-5, rtol=1e-5), (out3, ref3)

    print("KERNEL_OK")
</pallas_src>

<mosaic_0001>
module attributes {stable_mosaic.version = 11 : i64} {
  func.func @_sse_kernel(%arg0: i32, %arg1: i32, %arg2: memref<16x32xf32, #tpu.memory_space<vmem>>, %arg3: memref<16x32xf32, #tpu.memory_space<vmem>>, %arg4: memref<1x1x32xf32, #tpu.memory_space<vmem>>) attributes {dimension_semantics = [#tpu.dimension_semantics<arbitrary>, #tpu.dimension_semantics<arbitrary>], iteration_bounds = array<i64: 1, 1>, scalar_prefetch = 0 : i64, scratch_operands = 0 : i64, tpu.core_type = #tpu.core_type<tc>, window_params = [{transform_indices = @transform_0, window_bounds = array<i64: 16, 32>}, {transform_indices = @transform_1, window_bounds = array<i64: 16, 32>}, {transform_indices = @transform_2, window_bounds = array<i64: 1, 1, 32>}]} {
    %c0_i32 = arith.constant 0 : i32
    %0 = arith.cmpi eq, %arg1, %c0_i32 : i32
    %1 = arith.extui %0 : i1 to i32
    %c0_i32_0 = arith.constant 0 : i32
    %2 = arith.cmpi ne, %1, %c0_i32_0 : i32
    scf.if %2 {
      %cst_12 = arith.constant 0.000000e+00 : f32
      %23 = vector.broadcast %cst_12 : f32 to vector<1x1x32xf32>
      %c0_13 = arith.constant 0 : index
      %c0_14 = arith.constant 0 : index
      %c0_15 = arith.constant 0 : index
      %24 = vector.load %arg4[%c0_13, %c0_14, %c0_15] : memref<1x1x32xf32, #tpu.memory_space<vmem>>, vector<1x1x32xf32>
      tpu.vector_store %arg4[%c0_13, %c0_14, %c0_15], %23 {strides = array<i32>} : memref<1x1x32xf32, #tpu.memory_space<vmem>>, vector<1x1x32xf32>,
    } else {
    }
    %c0 = arith.constant 0 : index
    %c0_1 = arith.constant 0 : index
    %3 = vector.load %arg2[%c0, %c0_1] : memref<16x32xf32, #tpu.memory_space<vmem>>, vector<16x32xf32>
    %c0_2 = arith.constant 0 : index
    %c0_3 = arith.constant 0 : index
    %4 = vector.load %arg3[%c0_2, %c0_3] : memref<16x32xf32, #tpu.memory_space<vmem>>, vector<16x32xf32>
    %5 = arith.subf %3, %4 : vector<16x32xf32>
    %c1_i32 = arith.constant 1 : i32
    %6 = arith.muli %arg0, %c1_i32 : i32
    %7 = arith.addi %6, %arg1 : i32
    %c16_i32 = arith.constant 16 : i32
    %8 = arith.muli %7, %c16_i32 : i32
    %9 = tpu.iota {dimensions = array<i32: 0>} : vector<16x32xi32>
    %10 = vector.broadcast %8 : i32 to vector<16x32xi32>
    %11 = arith.addi %10, %9 : vector<16x32xi32>
    %c16_i32_4 = arith.constant 16 : i32
    %12 = vector.broadcast %c16_i32_4 : i32 to vector<16x32xi32>
    %13 = arith.cmpi slt, %11, %12 : vector<16x32xi32>
    %14 = arith.mulf %5, %5 : vector<16x32xf32>
    %cst = arith.constant 0.000000e+00 : f32
    %15 = vector.broadcast %cst : f32 to vector<16x32xf32>
    %16 = arith.select %13, %14, %15 : vector<16x32xi1>, vector<16x32xf32>
    %c0_5 = arith.constant 0 : index
    %c0_6 = arith.constant 0 : index
    %c0_7 = arith.constant 0 : index
    %17 = vector.load %arg4[%c0_5, %c0_6, %c0_7] : memref<1x1x32xf32, #tpu.memory_space<vmem>>, vector<1x1x32xf32>
    %cst_8 = arith.constant dense<0.000000e+00> : vector<32xf32>
    %18 = vector.multi_reduction <add>, %16, %cst_8 [0] : vector<16x32xf32> to vector<32xf32>
    %19 = vector.shape_cast %18 : vector<32xf32> to vector<1x32xf32>
    %20 = vector.shape_cast %19 : vector<1x32xf32> to vector<1x1x32xf32>
    %21 = arith.addf %17, %20 : vector<1x1x32xf32>
    %c0_9 = arith.constant 0 : index
    %c0_10 = arith.constant 0 : index
    %c0_11 = arith.constant 0 : index
    %22 = vector.load %arg4[%c0_9, %c0_10, %c0_11] : memref<1x1x32xf32, #tpu.memory_space<vmem>>, vector<1x1x32xf32>
    tpu.vector_store %arg4[%c0_9, %c0_10, %c0_11], %21 {strides = array<i32>} : memref<1x1x32xf32, #tpu.memory_space<vmem>>, vector<1x1x32xf32>,
    return
  }
  func.func @transform_0(%arg0: i32, %arg1: i32) -> (i32, i32) {
    %c1_i32 = arith.constant 1 : i32
    %0 = arith.muli %arg0, %c1_i32 : i32
    %1 = arith.addi %0, %arg1 : i32
    %c0_i32 = arith.constant 0 : i32
    %2 = arith.minsi %1, %c0_i32 : i32
    %c0_i32_0 = arith.constant 0 : i32
    %c0_i32_1 = arith.constant 0 : i32
    return %2, %c0_i32_0 : i32, i32
  }
  func.func @transform_1(%arg0: i32, %arg1: i32) -> (i32, i32) {
    %c1_i32 = arith.constant 1 : i32
    %0 = arith.muli %arg0, %c1_i32 : i32
    %1 = arith.addi %0, %arg1 : i32
    %c0_i32 = arith.constant 0 : i32
    %2 = arith.minsi %1, %c0_i32 : i32
    %c0_i32_0 = arith.constant 0 : i32
    %c0_i32_1 = arith.constant 0 : i32
    return %2, %c0_i32_0 : i32, i32
  }
  func.func @transform_2(%arg0: i32, %arg1: i32) -> (i32, i32, i32) {
    %c0_i32 = arith.constant 0 : i32
    %c0_i32_0 = arith.constant 0 : i32
    %c0_i32_1 = arith.constant 0 : i32
    return %arg0, %c0_i32, %c0_i32_0 : i32, i32, i32
  }
}

</mosaic_0001>

<bundles_post_ra>
// kernel: tpu_custom_call.1
= control target key start
LH: loop header
LB: loop body
LE: loop exit
PB: predicated region body
PF: predicated region fallthrough
CT: control target
= control target key end

     0   :  { %7 = vsyncpa [#allocation3], 0  ;;  %s242_s0 = inlined_call_operand.hbm [shape: f32[16,32], index: 0, kind: input, shape index: {}]   ;;  %s243_s1 = inlined_call_operand.hbm [shape: f32[16,32], index: 1, kind: input, shape index: {}]   ;;  %s244_s2 = inlined_call_operand.hbm [shape: f32[1,1,32], index: 2, kind: output, shape index: {}]  }
   0x1   :  { %8 = vsyncpa [#allocation6], 0 }
   0x2   :  { %9 = vsyncpa [#allocation4], 0  ;;  %s20_s11 = sshll.u32 %s242_s0, 4  ;;  %s210_s12 = smov [#allocation2]   ;;  %s21_s11 = int_to_ptr.hbm [resolvable:$true] %s20_s11 }
   0x3   :  { %s22_s13 = sshll.u32 %s210_s12, 4  ;;  %s39_s16 = sshll.u32 %s243_s1, 4  ;;  %s23_s13 = int_to_ptr.vmem [resolvable:$true] %s22_s13  ;;  %s40_s16 = int_to_ptr.hbm [resolvable:$true] %s39_s16 }
   0x4   :  { %s211_s17 = smov 128   ;;  %s212_s18 = smov 8  }
   0x5   :  { %28 = dma.hbm_to_vmem [thread:$0]  %s21_s11, 256, %s23_s13, [#allocation3], %s211_s17, %s211_s17, %s212_s18  }
   0x6   :  { %s213_s19 = smov [#allocation5]  }
   0x7   :  { %s41_s20 = sshll.u32 %s213_s19, 4  ;;  %s42_s20 = int_to_ptr.vmem [resolvable:$true] %s41_s20 }
   0x8   :  { %47 = dma.hbm_to_vmem [thread:$0]  %s40_s16, 256, %s42_s20, [#allocation6], %s211_s17, %s211_s17, %s212_s18  }
   0x9   :  { %204 = dma.done.wait [#allocation3], 256  }
   0xa   :  { %205 = vsyncadd [#allocation3], 4294967040 }
   0xb   :  { %206 = dma.done.wait [#allocation6], 256  }
   0xc   :  { %207 = vsyncadd [#allocation6], 4294967040  ;;  %vm68_vm0 = vcmask 253952   ;;  %v214_v0 = vmov 0.0   ;;  %v70_v1 = vld [vmem:[#allocation2] sm:$0xff]  ;;  %v71_v2 = vld [vmem:[#allocation2 + $0x8] sm:$0xff] }
   0xd   :  { %69 = vst.msk [vmem:[#allocation7] sm:$0x1] %vm68_vm0, %v214_v0  ;;  %v72_v3 = vld [vmem:[#allocation5] sm:$0xff]  ;;  %v73_v4 = vld [vmem:[#allocation5 + $0x8] sm:$0xff]  ;;  %vm91_vm1 = vcmask 261120   ;;  %s215_s0 = smov [#allocation7]  }
   0xe   :  { %v74_v5 = vsub.f32 %v70_v1, %v72_v3  ;;  %v75_v6 = vsub.f32 %v71_v2, %v73_v4  ;;  %s109_s1 = sshll.u32 %s215_s0, 4  ;;  %s111_s23 = sshll.u32 %s244_s2, 4  ;;  %s110_s1 = int_to_ptr.vmem [resolvable:$true] %s109_s1  ;;  %s112_s23 = int_to_ptr.hbm [resolvable:$true] %s111_s23 }
  0x10   :  { %v86_v7 = vmul.f32 %v74_v5, %v74_v5  ;;  %v87_v8 = vmul.f32 %v75_v6, %v75_v6 }
  0x12   :  { %v92_v9 = vsel %vm91_vm1, %v86_v7, 0.0  ;;  %v93_v10 = vsel %vm91_vm1, %v87_v8, 0.0 }
  0x13   :  { %v94_v11 = vadd.f32 %v93_v10, %v92_v9 }
  0x14   :  { %v90_v17 = vld [vmem:[#allocation7] sm:$0x1] }
  0x15   :  { %v95_v12 = vrot.slane %v94_v11, 4 }
  0x17   :  { %v96_v13 = vadd.f32 %v95_v12, %v94_v11 }
  0x19   :  { %v97_v14 = vrot.slane %v96_v13, 2 }
  0x1b   :  { %v98_v15 = vadd.f32 %v97_v14, %v96_v13 }
  0x1d   :  { %v99_v16 = vrot.slane %v98_v15, 1 }
  0x1f   :  { %v100_v18 = vadd.f32 %v99_v16, %v98_v15 }
  0x21   :  { %v101_v19 = vadd.f32 %v100_v18, %v90_v17 }
  0x23   :  { %103 = vst.msk [vmem:[#allocation7] sm:$0x1] %vm68_vm0, %v101_v19 }
  0x24   :  { %114 = dma.vmem_to_hbm [thread:$0]  %s110_s1, 16, %s112_s23, [#allocation4]  }
  0x25   :  { %208 = dma.done.wait [#allocation4], 16  }
  0x26   :  { %209 = vsyncadd [#allocation4], 4294967280 }
  0x27   :  { %119 = vsyncpa [#allocation3], 1 }
  0x28   :  { %120 = vsyncpa [#allocation6], 1 }
  0x29   :  { %121 = vsyncpa [#allocation4], 1 }

</bundles_post_ra>
